<compile_context>
chip_gen: v6e
topology: v6e:2x2x1
jax: 0.10.0
libtpu: 0.0.40
codegen_flags: <defaults>
</compile_context>

<pallas_src>
import functools

import jax
import jax.numpy as jnp
from jax.experimental import pallas as pl
from jax.experimental.pallas import tpu as pltpu

_LANE = 128
_DEFAULT_BN = 256 * 1024            # lanes per grid step (sweepable 128K-512K)
_VMEM_LIMIT = 28 * 1024 * 1024      # explicit scoped-VMEM limit: fits 256K-lane tiles on v5e too


def _ballistic_kernel(w_ref, xt_ref, o_ref):
    # w_ref : SMEM (6,)           raw weights [w0..w5], read as scalars
    # xt_ref: VMEM (7, bs, 128)   planes 0..5 = x components, plane 6 = t (batch dense)
    # o_ref : VMEM (2, bs, 128)   plane 0 = out_x, plane 1 = out_y
    f32 = jnp.float32
    w0 = w_ref[0]
    w1 = w_ref[1]
    w2 = w_ref[2]
    w3 = w_ref[3]
    w455 = w_ref[4] * w_ref[5] * w_ref[5]      # fold w4*w5^2 once on the scalar unit

    x0 = xt_ref[0].astype(f32)
    x1 = xt_ref[1].astype(f32)
    x2 = xt_ref[2].astype(f32)
    x3 = xt_ref[3].astype(f32)
    x4 = xt_ref[4].astype(f32)
    x5 = xt_ref[5].astype(f32)
    t = xt_ref[6].astype(f32)

    q = t * x5                                  # t * x5 (w5 already folded into w455)
    out_x = x0 * w0 + x1 * (t * w1)
    out_y = x2 * w2 + x3 * (t * w3) + x4 * (w455 * (q * q))

    o_ref[0] = out_x.astype(o_ref.dtype)
    o_ref[1] = out_y.astype(o_ref.dtype)


@functools.partial(jax.jit, static_argnames=("bn",))
def ballistic_soa(weight, xt, *, bn=None):
    """Fast SoA path. xt: (7, N) with rows [x0..x5, t]; N a multiple of 128.

    Returns (2, N): row 0 = output_x, row 1 = output_y. Prefer this entry point in
    production so no transpose/relayout passes over HBM are needed.
    """
    seven, n = xt.shape
    assert seven == 7, "xt must be (7, N): six state rows + t"
    assert n % _LANE == 0, "N must be a multiple of 128 (pad in the caller)"

    nb = n // _LANE                                     # batch in 128-lane rows
    if bn is None:
        bn = _DEFAULT_BN
    assert bn % _LANE == 0, "bn must be a multiple of 128"

    # Sublane extent of each block: multiple of 8, or the full extent for small N.
    bs = bn // _LANE
    if bs >= nb:
        bs = nb
    else:
        bs = (bs // 8) * 8
        if bs == 0:
            bs = nb

    xt3 = xt.reshape(7, nb, _LANE)                      # free (bitcast) reshape

    out3 = pl.pallas_call(
        _ballistic_kernel,
        out_shape=jax.ShapeDtypeStruct((2, nb, _LANE), xt.dtype),
        grid_spec=pltpu.PrefetchScalarGridSpec(
            num_scalar_prefetch=0,
            grid=(pl.cdiv(nb, bs),),                    # ragged last block is masked
            in_specs=[
                pl.BlockSpec(memory_space=pltpu.MemorySpace.SMEM),      # weight (6,)
                pl.BlockSpec((7, bs, _LANE), lambda i: (0, i, 0)),      # [x0..x5, t]
            ],
            out_specs=pl.BlockSpec((2, bs, _LANE), lambda i: (0, i, 0)),  # [out_x, out_y]
        ),
        compiler_params=pltpu.CompilerParams(
            dimension_semantics=("parallel",),          # shards grid across TCs on v7x
            vmem_limit_bytes=_VMEM_LIMIT,
        ),
        cost_estimate=pl.CostEstimate(
            flops=13 * n, transcendentals=0, bytes_accessed=36 * n,
        ),
    )(weight.astype(jnp.float32), xt3)

    return out3.reshape(2, n)                           # free (bitcast) reshape


@jax.jit
def ballistic(weight, input_1, t):
    """Original module contract: weight (6,), input_1 (N, 6), t (N,) -> (N, 2).

    The concat/pad/transpose below is an extra pass over a narrow array and exists
    only to preserve the PyTorch calling convention; use `ballistic_soa` to avoid it.
    """
    N = input_1.shape[0]
    n_pad = ((N + _LANE - 1) // _LANE) * _LANE          # pad only to 128, not to tile size

    xt = jnp.concatenate([input_1, t[:, None]], axis=1)  # (N, 7)
    xt = jnp.pad(xt, ((0, n_pad - N), (0, 0))).T         # (7, n_pad), batch on lanes

    out = ballistic_soa(weight, xt)                      # (2, n_pad)
    return out[:, :N].T                                  # (N, 2)


def ballistic_ref(weight, input_1, t):
    out_x = input_1[:, 0] * weight[0] + input_1[:, 1] * t * weight[1]
    out_y = (input_1[:, 2] * weight[2]
             + input_1[:, 3] * t * weight[3]
             + input_1[:, 4] * weight[4] * (t * input_1[:, 5] * weight[5]) ** 2)
    return jnp.concatenate((out_x.reshape(-1, 1), out_y.reshape(-1, 1)), axis=1)


if __name__ == "__main__":
    key = jax.random.PRNGKey(0)
    k_w, k_x, k_t, k_x2, k_t2 = jax.random.split(key, 5)

    # Deterministic parameter init mirroring reset_parameters():
    # uniform(-stdv, stdv) with stdv = 1/sqrt(6)
    stdv = 1.0 / jnp.sqrt(6.0)
    weight = jax.random.uniform(k_w, (6,), dtype=jnp.float32,
                                minval=-stdv, maxval=stdv)

    # --- Test 1: module-contract path, N not a multiple of 128 (padding path). ---
    N = 200
    input_1 = jax.random.normal(k_x, (N, 6), dtype=jnp.float32)
    t = jax.random.uniform(k_t, (N,), dtype=jnp.float32, minval=0.0, maxval=2.0)

    ref = ballistic_ref(weight, input_1, t)
    out = jax.block_until_ready(ballistic(weight, input_1, t))
    assert out.shape == (N, 2)
    assert jnp.allclose(out, ref, atol=1e-5, rtol=1e-5), "mismatch vs reference (contract path)"

    # --- Test 2: SoA fast path with a multi-step grid and a ragged last block. ---
    # N2 = 20 rows of 128 lanes; bn = 1024 lanes -> bs = 8 sublanes, grid = cdiv(20, 8) = 3,
    # final block is partial (masked writeback).
    N2 = 20 * _LANE
    input_2 = jax.random.normal(k_x2, (N2, 6), dtype=jnp.float32)
    t2 = jax.random.uniform(k_t2, (N2,), dtype=jnp.float32, minval=0.0, maxval=2.0)
    ref2 = ballistic_ref(weight, input_2, t2)

    xt2 = jnp.concatenate([input_2, t2[:, None]], axis=1).T  # (7, N2), already 128-aligned
    out_soa = jax.block_until_ready(ballistic_soa(weight, xt2, bn=1024))  # (2, N2)
    assert out_soa.shape == (2, N2)
    assert jnp.allclose(out_soa.T, ref2, atol=1e-5, rtol=1e-5), "mismatch vs reference (SoA path)"

    print("KERNEL_OK")
</pallas_src>

<mosaic_0001>
module attributes {stable_mosaic.version = 11 : i64} {
  func.func @_ballistic_kernel(%arg0: i32, %arg1: memref<6xf32, #tpu.memory_space<smem>>, %arg2: memref<7x2x128xf32, #tpu.memory_space<vmem>>, %arg3: memref<2x2x128xf32, #tpu.memory_space<vmem>>) attributes {dimension_semantics = [#tpu.dimension_semantics<parallel>], iteration_bounds = array<i64: 1>, scalar_prefetch = 0 : i64, scratch_operands = 0 : i64, tpu.core_type = #tpu.core_type<tc>, window_params = [{transform_indices = @transform_0, window_bounds = array<i64: 6>}, {transform_indices = @transform_1, window_bounds = array<i64: 7, 2, 128>}, {transform_indices = @transform_2, window_bounds = array<i64: 2, 2, 128>}]} {
    %c0 = arith.constant 0 : index
    %0 = memref.load %arg1[%c0] : memref<6xf32, #tpu.memory_space<smem>>
    %c1 = arith.constant 1 : index
    %1 = memref.load %arg1[%c1] : memref<6xf32, #tpu.memory_space<smem>>
    %c2 = arith.constant 2 : index
    %2 = memref.load %arg1[%c2] : memref<6xf32, #tpu.memory_space<smem>>
    %c3 = arith.constant 3 : index
    %3 = memref.load %arg1[%c3] : memref<6xf32, #tpu.memory_space<smem>>
    %c4 = arith.constant 4 : index
    %4 = memref.load %arg1[%c4] : memref<6xf32, #tpu.memory_space<smem>>
    %c5 = arith.constant 5 : index
    %5 = memref.load %arg1[%c5] : memref<6xf32, #tpu.memory_space<smem>>
    %6 = arith.mulf %4, %5 : f32
    %c5_0 = arith.constant 5 : index
    %7 = memref.load %arg1[%c5_0] : memref<6xf32, #tpu.memory_space<smem>>
    %8 = arith.mulf %6, %7 : f32
    %c0_1 = arith.constant 0 : index
    %c0_2 = arith.constant 0 : index
    %c0_3 = arith.constant 0 : index
    %9 = vector.load %arg2[%c0_1, %c0_2, %c0_3] : memref<7x2x128xf32, #tpu.memory_space<vmem>>, vector<1x2x128xf32>
    %10 = vector.shape_cast %9 : vector<1x2x128xf32> to vector<2x128xf32>
    %c1_4 = arith.constant 1 : index
    %c0_5 = arith.constant 0 : index
    %c0_6 = arith.constant 0 : index
    %11 = vector.load %arg2[%c1_4, %c0_5, %c0_6] : memref<7x2x128xf32, #tpu.memory_space<vmem>>, vector<1x2x128xf32>
    %12 = vector.shape_cast %11 : vector<1x2x128xf32> to vector<2x128xf32>
    %c2_7 = arith.constant 2 : index
    %c0_8 = arith.constant 0 : index
    %c0_9 = arith.constant 0 : index
    %13 = vector.load %arg2[%c2_7, %c0_8, %c0_9] : memref<7x2x128xf32, #tpu.memory_space<vmem>>, vector<1x2x128xf32>
    %14 = vector.shape_cast %13 : vector<1x2x128xf32> to vector<2x128xf32>
    %c3_10 = arith.constant 3 : index
    %c0_11 = arith.constant 0 : index
    %c0_12 = arith.constant 0 : index
    %15 = vector.load %arg2[%c3_10, %c0_11, %c0_12] : memref<7x2x128xf32, #tpu.memory_space<vmem>>, vector<1x2x128xf32>
    %16 = vector.shape_cast %15 : vector<1x2x128xf32> to vector<2x128xf32>
    %c4_13 = arith.constant 4 : index
    %c0_14 = arith.constant 0 : index
    %c0_15 = arith.constant 0 : index
    %17 = vector.load %arg2[%c4_13, %c0_14, %c0_15] : memref<7x2x128xf32, #tpu.memory_space<vmem>>, vector<1x2x128xf32>
    %18 = vector.shape_cast %17 : vector<1x2x128xf32> to vector<2x128xf32>
    %c5_16 = arith.constant 5 : index
    %c0_17 = arith.constant 0 : index
    %c0_18 = arith.constant 0 : index
    %19 = vector.load %arg2[%c5_16, %c0_17, %c0_18] : memref<7x2x128xf32, #tpu.memory_space<vmem>>, vector<1x2x128xf32>
    %20 = vector.shape_cast %19 : vector<1x2x128xf32> to vector<2x128xf32>
    %c6 = arith.constant 6 : index
    %c0_19 = arith.constant 0 : index
    %c0_20 = arith.constant 0 : index
    %21 = vector.load %arg2[%c6, %c0_19, %c0_20] : memref<7x2x128xf32, #tpu.memory_space<vmem>>, vector<1x2x128xf32>
    %22 = vector.shape_cast %21 : vector<1x2x128xf32> to vector<2x128xf32>
    %23 = arith.mulf %22, %20 : vector<2x128xf32>
    %24 = vector.broadcast %0 : f32 to vector<2x128xf32>
    %25 = arith.mulf %10, %24 : vector<2x128xf32>
    %26 = vector.broadcast %1 : f32 to vector<2x128xf32>
    %27 = arith.mulf %22, %26 : vector<2x128xf32>
    %28 = arith.mulf %12, %27 : vector<2x128xf32>
    %29 = arith.addf %25, %28 : vector<2x128xf32>
    %30 = vector.broadcast %2 : f32 to vector<2x128xf32>
    %31 = arith.mulf %14, %30 : vector<2x128xf32>
    %32 = vector.broadcast %3 : f32 to vector<2x128xf32>
    %33 = arith.mulf %22, %32 : vector<2x128xf32>
    %34 = arith.mulf %16, %33 : vector<2x128xf32>
    %35 = arith.addf %31, %34 : vector<2x128xf32>
    %36 = arith.mulf %23, %23 : vector<2x128xf32>
    %37 = vector.broadcast %8 : f32 to vector<2x128xf32>
    %38 = arith.mulf %37, %36 : vector<2x128xf32>
    %39 = arith.mulf %18, %38 : vector<2x128xf32>
    %40 = arith.addf %35, %39 : vector<2x128xf32>
    %c0_21 = arith.constant 0 : index
    %c0_22 = arith.constant 0 : index
    %c0_23 = arith.constant 0 : index
    %41 = vector.load %arg3[%c0_21, %c0_22, %c0_23] : memref<2x2x128xf32, #tpu.memory_space<vmem>>, vector<1x2x128xf32>
    %42 = vector.shape_cast %41 : vector<1x2x128xf32> to vector<2x128xf32>
    %43 = vector.shape_cast %29 : vector<2x128xf32> to vector<1x2x128xf32>
    tpu.vector_store %arg3[%c0_21, %c0_22, %c0_23], %43 {strides = array<i32>} : memref<2x2x128xf32, #tpu.memory_space<vmem>>, vector<1x2x128xf32>,
    %c1_24 = arith.constant 1 : index
    %c0_25 = arith.constant 0 : index
    %c0_26 = arith.constant 0 : index
    %44 = vector.load %arg3[%c1_24, %c0_25, %c0_26] : memref<2x2x128xf32, #tpu.memory_space<vmem>>, vector<1x2x128xf32>
    %45 = vector.shape_cast %44 : vector<1x2x128xf32> to vector<2x128xf32>
    %46 = vector.shape_cast %40 : vector<2x128xf32> to vector<1x2x128xf32>
    tpu.vector_store %arg3[%c1_24, %c0_25, %c0_26], %46 {strides = array<i32>} : memref<2x2x128xf32, #tpu.memory_space<vmem>>, vector<1x2x128xf32>,
    return
  }
  func.func @transform_0(%arg0: i32) -> i32 {
    %c0_i32 = arith.constant 0 : i32
    %c0_i32_0 = arith.constant 0 : i32
    return %c0_i32 : i32
  }
  func.func @transform_1(%arg0: i32) -> (i32, i32, i32) {
    %c0_i32 = arith.constant 0 : i32
    %c0_i32_0 = arith.constant 0 : i32
    %c0_i32_1 = arith.constant 0 : i32
    return %c0_i32, %arg0, %c0_i32_0 : i32, i32, i32
  }
  func.func @transform_2(%arg0: i32) -> (i32, i32, i32) {
    %c0_i32 = arith.constant 0 : i32
    %c0_i32_0 = arith.constant 0 : i32
    %c0_i32_1 = arith.constant 0 : i32
    return %c0_i32, %arg0, %c0_i32_0 : i32, i32, i32
  }
}

</mosaic_0001>

<bundles_post_ra>
// kernel: ballistic_soa.1
= control target key start
LH: loop header
LB: loop body
LE: loop exit
PB: predicated region body
PF: predicated region fallthrough
CT: control target
= control target key end

     0   :  { %7 = vsyncpa [#allocation3], 0  ;;  %s144_s0 = inlined_call_operand.vmem [shape: f32[6], index: 0, kind: input, shape index: {}]   ;;  %s145_s1 = inlined_call_operand.vmem [shape: f32[7,2,128], index: 1, kind: input, shape index: {}]   ;;  %s146_s2 = inlined_call_operand.vmem [shape: f32[2,2,128], index: 2, kind: output, shape index: {}]  }
   0x1   :  { %s14_s11 = sshll.u32 %s144_s0, 4  ;;  %s15_s11 = int_to_ptr.vmem [resolvable:$true] %s14_s11 }
   0x2   :  { %s84_s12 = scalar_lea.vmem %s15_s11, 16  ;;  %p89_p1 = scmp.lt.s32.totalorder %s15_s11, %s15_s11 }
   0x3   :  { %p85_p0 = scmp.ne.s32.totalorder %s15_s11, %s84_s12  ;;  %p90_p2 = scmp.lt.s32.totalorder %s84_s12, %s84_s12 }
   0x5   :  { %p91_p3 = por %p90_p2, %p89_p1 }
   0x7   :  { %p92_p4 = pnand %p91_p3, %p85_p0 }
   0x9   :  { %95 = shalt.err (!%p92_p4)
}
   0xa   :  { %s98_s13 = smov [#allocation2]  }
   0xb   :  { %17 = dma.vmem_to_smem %s15_s11, 16, %s98_s13, [#allocation3]  }
   0xc   :  { %96 = dma.done.wait [#allocation3], 16  }
   0xd   :  { %97 = vsyncadd [#allocation3], 4294967280 }
   0xe   :  { %23 = sfence }
   0xf   :  { %s24_s14 = sld [smem:[#allocation2]]  ;;  %v32_v0 = vld [vmem:[%s145_s1] sm:$0x3]  ;;  %v81_v1 = vld [vmem:[%s145_s1 + $0xc] sm:$0x3] }
  0x10   :  { %s71_s15 = sld [smem:[#allocation2 + $0x1]]  ;;  %v80_v2 = vld [vmem:[%s145_s1 + $0xa] sm:$0x3]  ;;  %v76_v4 = vld [vmem:[%s145_s1 + $0x2] sm:$0x3] }
  0x11   :  { %s72_s16 = sld [smem:[#allocation2 + $0x2]]  ;;  %v45_v8 = vmul.f32 %v81_v1, %v80_v2  ;;  %v77_v9 = vld [vmem:[%s145_s1 + $0x4] sm:$0x3]  ;;  %v78_v10 = vld [vmem:[%s145_s1 + $0x6] sm:$0x3] }
  0x12   :  { %s73_s17 = sld [smem:[#allocation2 + $0x3]]  ;;  %v79_v19 = vld [vmem:[%s145_s1 + $0x8] sm:$0x3] }
  0x13   :  { %s74_s0 = sld [smem:[#allocation2 + $0x4]]  ;;  %v58_v18 = vmul.f32 %v45_v8, %v45_v8 }
  0x14   :  { %s75_s22 = sld [smem:[#allocation2 + $0x5]] }
  0x15   :  { %v46_v3 = vstv %s24_s14 }
  0x16   :  { %v48_v5 = vstv %s71_s15  ;;  %v47_v6 = vmul.f32 %v46_v3, %v32_v0 }
  0x17   :  { %v49_v7 = vmul.f32 %v81_v1, %v48_v5  ;;  %v52_v11 = vstv %s72_s16 }
  0x18   :  { %v54_v12 = vstv %s73_s17  ;;  %v53_v16 = vmul.f32 %v77_v9, %v52_v11 }
  0x19   :  { %v50_v13 = vmul.f32 %v76_v4, %v49_v7  ;;  %v55_v14 = vmul.f32 %v81_v1, %v54_v12 }
  0x1a   :  { %s30_s3 = smul.f32 %s75_s22, %s74_s0 }
  0x1b   :  { %v51_v15 = vadd.f32 %v50_v13, %v47_v6  ;;  %v56_v17 = vmul.f32 %v78_v10, %v55_v14 }
  0x1c   :  { %s31_s4 = smul.f32 %s75_s22, %s30_s3 }
  0x1d   :  { %63 = vst [vmem:[%s146_s2] sm:$0x3] %v51_v15  ;;  %v57_v21 = vadd.f32 %v56_v17, %v53_v16 }
  0x1e   :  { %v59_v20 = vstv %s31_s4 }
  0x1f   :  { %v60_v22 = vmul.f32 %v59_v20, %v58_v18 }
  0x21   :  { %v61_v23 = vmul.f32 %v79_v19, %v60_v22 }
  0x23   :  { %v62_v24 = vadd.f32 %v61_v23, %v57_v21 }
  0x25   :  { %82 = vst [vmem:[%s146_s2 + $0x2] sm:$0x3] %v62_v24 }
  0x26   :  { %70 = vsyncpa [#allocation3], 1 }

</bundles_post_ra>
